<compile_context>
chip_gen: v6e
topology: v6e:2x2x1
jax: 0.10.0
libtpu: 0.0.40
codegen_flags: <defaults>
</compile_context>

<pallas_src>
import functools
import math

import jax
import jax.numpy as jnp
from jax.experimental import pallas as pl
from jax.experimental.pallas import tpu as pltpu


def _conv3x3_kn2row_kernel(x_ref, top_ref, bot_ref, w_ref, b_ref, o_ref, acc_ref,
                           *, th, ow, cout):
    # x_ref  : (Cin, TH*OW)      space-to-depth activations, one row tile (flat, NCHW)
    # top_ref: (Cin, OW)         image row just above the tile (zeros at image top)
    # bot_ref: (Cin, OW)         image row just below the tile (zeros at image bottom)
    # w_ref  : (3, 3*Cout, Cin)  weights, w_ref[kh][kw*Cout + o, c] = weight[o, c, kh, kw]
    # b_ref  : (Cout, 1)         bias (f32)
    # o_ref  : (Cout, TH*OW)     output tile (flat NCHW, lane-dense)
    # acc_ref: (Cout, TH*OW)     f32 accumulator scratch
    n = th * ow
    acc_ref[...] = jnp.zeros_like(acc_ref)

    # Lane masks implementing the conv's zero padding in the width direction
    # (kills the wrap-around of +/-1 column shifts on the flattened row axis).
    col = jax.lax.broadcasted_iota(jnp.int32, (1, n), 1) % ow
    not_first = col != 0           # valid destinations for kw == 0 taps
    not_last = col != (ow - 1)     # valid destinations for kw == 2 taps

    x = x_ref[...]
    # Main-block taps: one MXU matmul per kh (M = 3*Cout), then 3 shifted adds.
    for kh in range(3):
        y = jnp.dot(w_ref[kh], x, preferred_element_type=jnp.float32)  # (3*Cout, n)
        d0 = max(0, 1 - kh) * ow               # dest rows whose source row is in-tile
        d1 = (th - max(0, kh - 1)) * ow
        for kw in range(3):
            delta = (kh - 1) * ow + (kw - 1)   # flat source offset for this tap
            lo = max(d0, -delta)
            hi = min(d1, n - delta)
            if lo >= hi:
                continue
            contrib = y[kw * cout:(kw + 1) * cout, lo + delta:hi + delta]
            if kw == 0:
                contrib = jnp.where(not_first[:, lo:hi], contrib, 0.0)
            elif kw == 2:
                contrib = jnp.where(not_last[:, lo:hi], contrib, 0.0)
            acc_ref[:, lo:hi] += contrib

    # Halo rows: top row feeds the kh=0 taps of the tile's first output row,
    # bottom row feeds the kh=2 taps of the tile's last output row.
    yt = jnp.dot(w_ref[0], top_ref[...], preferred_element_type=jnp.float32)  # (3*Cout, ow)
    yb = jnp.dot(w_ref[2], bot_ref[...], preferred_element_type=jnp.float32)
    base = (th - 1) * ow
    for kw in range(3):
        dc = kw - 1
        lo = max(0, -dc)
        hi = min(ow, ow - dc)
        acc_ref[:, lo:hi] += yt[kw * cout:(kw + 1) * cout, lo + dc:hi + dc]
        acc_ref[:, base + lo:base + hi] += yb[kw * cout:(kw + 1) * cout, lo + dc:hi + dc]

    o_ref[...] = (acc_ref[...] + b_ref[...]).astype(o_ref.dtype)


def _space_to_depth_nchw(x, size=2):
    """PyTorch SpaceToDepth channel order (c, s_h, s_w); output NCHW (B, c*size^2, OH, OW)."""
    b, c, h, w = x.shape
    oh, ow = h // size, w // size
    xs = x.reshape(b, c, oh, size, ow, size)
    xs = jnp.transpose(xs, (0, 1, 3, 5, 2, 4))
    return xs.reshape(b, c * size * size, oh, ow)


def _vmem_estimate(th, ow, cin, cout, itemsize):
    n = th * ow
    blocks = 2 * (cin * n + cout * n + 2 * cin * ow + 9 * cout * cin) * itemsize
    scratch = cout * n * 4
    temps = 2 * 3 * cout * n * 4        # kn2row per-kh matmul results (f32)
    return blocks + scratch + temps


def _pick_row_tile(oh, ow, cin, cout, itemsize, vmem_budget_bytes=24 << 20):
    """Largest row tile TH that (a) divides OH, (b) keeps TH*OW a multiple of 128
    (lane-dense blocks) unless TH == OH, and (c) fits the VMEM budget."""
    align = 128 // math.gcd(ow, 128)
    cands = [d for d in range(align, oh + 1, align) if oh % d == 0]
    fit = [d for d in cands if _vmem_estimate(d, ow, cin, cout, itemsize) <= vmem_budget_bytes]
    if fit:
        return max(fit)
    if cands:
        return min(cands)
    return oh


def _build_halos(xs4, th):
    """Per-row-tile halo rows of the s2d image: (B, T, Cin, OW) each, zeros at image edges."""
    b, cin, oh, ow = xs4.shape
    t = oh // th
    zero = jnp.zeros((b, 1, cin, ow), xs4.dtype)
    if t == 1:
        return zero, zero
    top_rows = xs4[:, :, th - 1:oh - 1:th, :]            # rows TH-1, 2TH-1, ...
    top = jnp.concatenate([zero, jnp.transpose(top_rows, (0, 2, 1, 3))], axis=1)
    bot_rows = xs4[:, :, th:oh:th, :]                    # rows TH, 2TH, ...
    bot = jnp.concatenate([jnp.transpose(bot_rows, (0, 2, 1, 3)), zero], axis=1)
    return top, bot


def downsample_depth(x, weight, bias, *, row_tile=None, compute_dtype=jnp.bfloat16):
    """x: (B, C, H, W) NCHW; weight: (C, 4C, 3, 3) OIHW (PyTorch); bias: (C,)."""
    b, c, h, w = x.shape
    assert h % 2 == 0 and w % 2 == 0, "spatial dims must be divisible by 2"
    oh, ow = h // 2, w // 2
    cin = 4 * c
    cout = weight.shape[0]
    assert weight.shape == (cout, cin, 3, 3)
    out_dtype = x.dtype
    c_itemsize = jnp.dtype(compute_dtype).itemsize

    # SpaceToDepth + cast (single XLA relayout pass), then free flatten to (B, Cin, OH*OW).
    xs4 = _space_to_depth_nchw(x).astype(compute_dtype)

    th = row_tile if row_tile is not None else _pick_row_tile(oh, ow, cin, cout, c_itemsize)
    assert oh % th == 0, f"row_tile {th} must divide OH {oh}"
    assert th == oh or (th * ow) % 128 == 0, "row tile must be lane-dense or full"
    t = oh // th
    n = th * ow

    halo_top, halo_bot = _build_halos(xs4, th)
    xs_flat = xs4.reshape(b, cin, oh * ow)

    # (3, 3*Cout, Cin): row kw*Cout + o of slab kh holds weight[o, :, kh, kw].
    w_r = jnp.transpose(weight, (2, 3, 0, 1)).reshape(3, 3 * cout, cin).astype(compute_dtype)
    bias2 = bias.reshape(cout, 1).astype(jnp.float32)

    est = _vmem_estimate(th, ow, cin, cout, c_itemsize)
    vmem_limit = int(min(64 << 20, max(2 * est, 16 << 20)))

    out_itemsize = jnp.dtype(out_dtype).itemsize
    cost = pl.CostEstimate(
        flops=2 * b * oh * ow * (9 * cin) * cout,
        transcendentals=0,
        bytes_accessed=((xs_flat.size + halo_top.size + halo_bot.size + w_r.size) * c_itemsize
                        + bias2.size * 4 + b * cout * oh * ow * out_itemsize),
    )

    kernel = functools.partial(_conv3x3_kn2row_kernel, th=th, ow=ow, cout=cout)

    out_flat = pl.pallas_call(
        kernel,
        out_shape=jax.ShapeDtypeStruct((b, cout, oh * ow), out_dtype),
        grid=(b, t),
        in_specs=[
            pl.BlockSpec((None, cin, n), lambda bi, ri: (bi, 0, ri)),
            pl.BlockSpec((None, None, cin, ow), lambda bi, ri: (bi, ri, 0, 0)),
            pl.BlockSpec((None, None, cin, ow), lambda bi, ri: (bi, ri, 0, 0)),
            pl.BlockSpec((3, 3 * cout, cin), lambda bi, ri: (0, 0, 0)),
            pl.BlockSpec((cout, 1), lambda bi, ri: (0, 0)),
        ],
        out_specs=pl.BlockSpec((None, cout, n), lambda bi, ri: (bi, 0, ri)),
        scratch_shapes=[pltpu.VMEM((cout, n), jnp.float32)],
        compiler_params=pltpu.CompilerParams(
            dimension_semantics=("parallel", "parallel"),
            vmem_limit_bytes=vmem_limit,
        ),
        cost_estimate=cost,
    )(xs_flat, halo_top, halo_bot, w_r, bias2)

    # Free (contiguous) reshape back to NCHW; no transpose / extra HBM pass.
    return out_flat.reshape(b, cout, oh, ow)


if __name__ == "__main__":
    key = jax.random.PRNGKey(0)
    kx, kw_, kb = jax.random.split(key, 3)

    def ref(x, weight, bias):
        b, c, h, w = x.shape
        oh, ow = h // 2, w // 2
        xs = x.reshape(b, c, oh, 2, ow, 2)
        xs = jnp.transpose(xs, (0, 1, 3, 5, 2, 4)).reshape(b, 4 * c, oh, ow)
        out = jax.lax.conv_general_dilated(
            xs, weight, window_strides=(1, 1), padding=((1, 1), (1, 1)),
            dimension_numbers=("NCHW", "OIHW", "NCHW"),
            precision=jax.lax.Precision.HIGHEST)
        return out + bias.reshape(1, -1, 1, 1)

    # (B, C, H, W, row_tile, compute_dtype, tolerance)
    configs = [
        (2, 4, 16, 16, None, jnp.float32, 1e-4),   # single tile, f32, tight check
        (2, 4, 32, 32, 8, jnp.float32, 1e-4),      # two row tiles -> real halo path, f32
        (2, 4, 32, 32, 8, jnp.bfloat16, 6e-2),     # bf16 fast path, two row tiles
    ]
    for (B, C, H, W, rt, cdt, tol) in configs:
        x = jax.random.normal(kx, (B, C, H, W), dtype=jnp.float32)
        weight = jax.random.normal(kw_, (C, 4 * C, 3, 3), dtype=jnp.float32) * 0.1
        bias = jax.random.normal(kb, (C,), dtype=jnp.float32) * 0.1

        fwd = jax.jit(functools.partial(downsample_depth, row_tile=rt, compute_dtype=cdt))
        y = jax.block_until_ready(fwd(x, weight, bias))
        y_ref = ref(x, weight, bias)

        assert y.shape == (B, C, H // 2, W // 2), (y.shape, (B, C, H // 2, W // 2))
        assert y.dtype == x.dtype, y.dtype
        max_err = float(jnp.max(jnp.abs(y - y_ref)))
        assert jnp.allclose(y, y_ref, atol=tol, rtol=tol), \
            (B, C, H, W, rt, str(cdt), max_err)

    print("KERNEL_OK")
</pallas_src>

<mosaic_0001>
module attributes {stable_mosaic.version = 11 : i64} {
  func.func @_conv3x3_kn2row_kernel(%arg0: i32, %arg1: i32, %arg2: memref<1x16x64xf32, #tpu.memory_space<vmem>>, %arg3: memref<1x1x16x8xf32, #tpu.memory_space<vmem>>, %arg4: memref<1x1x16x8xf32, #tpu.memory_space<vmem>>, %arg5: memref<3x12x16xf32, #tpu.memory_space<vmem>>, %arg6: memref<4x1xf32, #tpu.memory_space<vmem>>, %arg7: memref<1x4x64xf32, #tpu.memory_space<vmem>>, %arg8: memref<4x64xf32, #tpu.memory_space<vmem>>) attributes {dimension_semantics = [#tpu.dimension_semantics<parallel>, #tpu.dimension_semantics<parallel>], iteration_bounds = array<i64: 2, 1>, scalar_prefetch = 0 : i64, scratch_operands = 1 : i64, tpu.core_type = #tpu.core_type<tc>, window_params = [{transform_indices = @transform_0, window_bounds = array<i64: 1, 16, 64>}, {transform_indices = @transform_1, window_bounds = array<i64: 1, 1, 16, 8>}, {transform_indices = @transform_2, window_bounds = array<i64: 1, 1, 16, 8>}, {pipeline_mode = #tpu.pipeline_mode<synchronous>, transform_indices = @transform_3, window_bounds = array<i64: 3, 12, 16>}, {pipeline_mode = #tpu.pipeline_mode<synchronous>, transform_indices = @transform_4, window_bounds = array<i64: 4, 1>}, {transform_indices = @transform_5, window_bounds = array<i64: 1, 4, 64>}]} {
    %cst = arith.constant 0.000000e+00 : f32
    %0 = vector.broadcast %cst : f32 to vector<4x64xf32>
    %c0 = arith.constant 0 : index
    %c0_0 = arith.constant 0 : index
    %1 = vector.load %arg8[%c0, %c0_0] : memref<4x64xf32, #tpu.memory_space<vmem>>, vector<4x64xf32>
    tpu.vector_store %arg8[%c0, %c0_0], %0 {strides = array<i32>} : memref<4x64xf32, #tpu.memory_space<vmem>>, vector<4x64xf32>,
    %2 = tpu.iota {dimensions = array<i32: 1>} : vector<1x64xi32>
    %c8_i32 = arith.constant 8 : i32
    %c0_i32 = arith.constant 0 : i32
    %3 = arith.cmpi eq, %c8_i32, %c0_i32 : i32
    %c1_i32 = arith.constant 1 : i32
    %4 = arith.select %3, %c1_i32, %c8_i32 : i32
    %5 = vector.broadcast %4 : i32 to vector<1x64xi32>
    %6 = arith.remsi %2, %5 : vector<1x64xi32>
    %c0_i32_1 = arith.constant 0 : i32
    %7 = vector.broadcast %c0_i32_1 : i32 to vector<1x64xi32>
    %8 = arith.cmpi ne, %6, %7 : vector<1x64xi32>
    %c0_i32_2 = arith.constant 0 : i32
    %9 = vector.broadcast %c0_i32_2 : i32 to vector<1x64xi32>
    %10 = arith.cmpi slt, %6, %9 : vector<1x64xi32>
    %c0_i32_3 = arith.constant 0 : i32
    %11 = arith.cmpi slt, %4, %c0_i32_3 : i32
    %12 = vector.broadcast %11 : i1 to vector<1x64xi1>
    %13 = vector.broadcast %12 : vector<1x64xi1> to vector<1x64xi1>
    %14 = arith.xori %10, %13 : vector<1x64xi1>
    %15 = arith.andi %14, %8 : vector<1x64xi1>
    %16 = vector.broadcast %4 : i32 to vector<1x64xi32>
    %17 = arith.addi %6, %16 : vector<1x64xi32>
    %18 = arith.select %15, %17, %6 : vector<1x64xi1>, vector<1x64xi32>
    %c0_i32_4 = arith.constant 0 : i32
    %19 = vector.broadcast %c0_i32_4 : i32 to vector<1x64xi32>
    %20 = arith.cmpi ne, %18, %19 : vector<1x64xi32>
    %c7_i32 = arith.constant 7 : i32
    %21 = vector.broadcast %c7_i32 : i32 to vector<1x64xi32>
    %22 = arith.cmpi ne, %18, %21 : vector<1x64xi32>
    %c0_5 = arith.constant 0 : index
    %c0_6 = arith.constant 0 : index
    %c0_7 = arith.constant 0 : index
    %23 = vector.load %arg2[%c0_5, %c0_6, %c0_7] : memref<1x16x64xf32, #tpu.memory_space<vmem>>, vector<1x16x64xf32>
    %24 = vector.shape_cast %23 : vector<1x16x64xf32> to vector<16x64xf32>
    %c0_8 = arith.constant 0 : index
    %c0_9 = arith.constant 0 : index
    %c0_10 = arith.constant 0 : index
    %25 = vector.load %arg5[%c0_8, %c0_9, %c0_10] : memref<3x12x16xf32, #tpu.memory_space<vmem>>, vector<1x12x16xf32>
    %26 = vector.shape_cast %25 : vector<1x12x16xf32> to vector<12x16xf32>
    %cst_11 = arith.constant dense<0.000000e+00> : vector<12x64xf32>
    %27 = tpu.matmul %26, %24, %cst_11 {dimension_numbers = #tpu.dot_dimension_numbers<[1], [0], [0], [1], [0, 0, 1, 1], [], []>} : vector<12x16xf32>, vector<16x64xf32>, vector<12x64xf32> -> vector<12x64xf32>
    %28 = vector.extract_strided_slice %27 {offsets = [0, 0], sizes = [4, 55], strides = [1, 1]} : vector<12x64xf32> to vector<4x55xf32>
    %29 = vector.extract_strided_slice %20 {offsets = [0, 9], sizes = [1, 55], strides = [1, 1]} : vector<1x64xi1> to vector<1x55xi1>
    %cst_12 = arith.constant 0.000000e+00 : f32
    %30 = vector.shape_cast %29 : vector<1x55xi1> to vector<1x55xi1>
    %31 = vector.broadcast %30 : vector<1x55xi1> to vector<4x55xi1>
    %32 = vector.broadcast %cst_12 : f32 to vector<4x55xf32>
    %33 = arith.select %31, %28, %32 : vector<4x55xi1>, vector<4x55xf32>
    %c0_13 = arith.constant 0 : index
    %c9 = arith.constant 9 : index
    %34 = vector.load %arg8[%c0_13, %c9] : memref<4x64xf32, #tpu.memory_space<vmem>>, vector<4x55xf32>
    %35 = arith.addf %34, %33 : vector<4x55xf32>
    %c0_14 = arith.constant 0 : index
    %c9_15 = arith.constant 9 : index
    %36 = vector.load %arg8[%c0_14, %c9_15] : memref<4x64xf32, #tpu.memory_space<vmem>>, vector<4x55xf32>
    tpu.vector_store %arg8[%c0_14, %c9_15], %35 {strides = array<i32>} : memref<4x64xf32, #tpu.memory_space<vmem>>, vector<4x55xf32>,
    %37 = vector.extract_strided_slice %27 {offsets = [4, 0], sizes = [4, 56], strides = [1, 1]} : vector<12x64xf32> to vector<4x56xf32>
    %c0_16 = arith.constant 0 : index
    %c8 = arith.constant 8 : index
    %38 = vector.load %arg8[%c0_16, %c8] : memref<4x64xf32, #tpu.memory_space<vmem>>, vector<4x56xf32>
    %39 = arith.addf %38, %37 : vector<4x56xf32>
    %c0_17 = arith.constant 0 : index
    %c8_18 = arith.constant 8 : index
    %40 = vector.load %arg8[%c0_17, %c8_18] : memref<4x64xf32, #tpu.memory_space<vmem>>, vector<4x56xf32>
    tpu.vector_store %arg8[%c0_17, %c8_18], %39 {strides = array<i32>} : memref<4x64xf32, #tpu.memory_space<vmem>>, vector<4x56xf32>,
    %41 = vector.extract_strided_slice %27 {offsets = [8, 1], sizes = [4, 56], strides = [1, 1]} : vector<12x64xf32> to vector<4x56xf32>
    %42 = vector.extract_strided_slice %22 {offsets = [0, 8], sizes = [1, 56], strides = [1, 1]} : vector<1x64xi1> to vector<1x56xi1>
    %cst_19 = arith.constant 0.000000e+00 : f32
    %43 = vector.shape_cast %42 : vector<1x56xi1> to vector<1x56xi1>
    %44 = vector.broadcast %43 : vector<1x56xi1> to vector<4x56xi1>
    %45 = vector.broadcast %cst_19 : f32 to vector<4x56xf32>
    %46 = arith.select %44, %41, %45 : vector<4x56xi1>, vector<4x56xf32>
    %c0_20 = arith.constant 0 : index
    %c8_21 = arith.constant 8 : index
    %47 = vector.load %arg8[%c0_20, %c8_21] : memref<4x64xf32, #tpu.memory_space<vmem>>, vector<4x56xf32>
    %48 = arith.addf %47, %46 : vector<4x56xf32>
    %c0_22 = arith.constant 0 : index
    %c8_23 = arith.constant 8 : index
    %49 = vector.load %arg8[%c0_22, %c8_23] : memref<4x64xf32, #tpu.memory_space<vmem>>, vector<4x56xf32>
    tpu.vector_store %arg8[%c0_22, %c8_23], %48 {strides = array<i32>} : memref<4x64xf32, #tpu.memory_space<vmem>>, vector<4x56xf32>,
    %c1 = arith.constant 1 : index
    %c0_24 = arith.constant 0 : index
    %c0_25 = arith.constant 0 : index
    %50 = vector.load %arg5[%c1, %c0_24, %c0_25] : memref<3x12x16xf32, #tpu.memory_space<vmem>>, vector<1x12x16xf32>
    %51 = vector.shape_cast %50 : vector<1x12x16xf32> to vector<12x16xf32>
    %cst_26 = arith.constant dense<0.000000e+00> : vector<12x64xf32>
    %52 = tpu.matmul %51, %24, %cst_26 {dimension_numbers = #tpu.dot_dimension_numbers<[1], [0], [0], [1], [0, 0, 1, 1], [], []>} : vector<12x16xf32>, vector<16x64xf32>, vector<12x64xf32> -> vector<12x64xf32>
    %53 = vector.extract_strided_slice %52 {offsets = [0, 0], sizes = [4, 63], strides = [1, 1]} : vector<12x64xf32> to vector<4x63xf32>
    %54 = vector.extract_strided_slice %20 {offsets = [0, 1], sizes = [1, 63], strides = [1, 1]} : vector<1x64xi1> to vector<1x63xi1>
    %cst_27 = arith.constant 0.000000e+00 : f32
    %55 = vector.shape_cast %54 : vector<1x63xi1> to vector<1x63xi1>
    %56 = vector.broadcast %55 : vector<1x63xi1> to vector<4x63xi1>
    %57 = vector.broadcast %cst_27 : f32 to vector<4x63xf32>
    %58 = arith.select %56, %53, %57 : vector<4x63xi1>, vector<4x63xf32>
    %c0_28 = arith.constant 0 : index
    %c1_29 = arith.constant 1 : index
    %59 = vector.load %arg8[%c0_28, %c1_29] : memref<4x64xf32, #tpu.memory_space<vmem>>, vector<4x63xf32>
    %60 = arith.addf %59, %58 : vector<4x63xf32>
    %c0_30 = arith.constant 0 : index
    %c1_31 = arith.constant 1 : index
    %61 = vector.load %arg8[%c0_30, %c1_31] : memref<4x64xf32, #tpu.memory_space<vmem>>, vector<4x63xf32>
    tpu.vector_store %arg8[%c0_30, %c1_31], %60 {strides = array<i32>} : memref<4x64xf32, #tpu.memory_space<vmem>>, vector<4x63xf32>,
    %62 = vector.extract_strided_slice %52 {offsets = [4, 0], sizes = [4, 64], strides = [1, 1]} : vector<12x64xf32> to vector<4x64xf32>
    %c0_32 = arith.constant 0 : index
    %c0_33 = arith.constant 0 : index
    %63 = vector.load %arg8[%c0_32, %c0_33] : memref<4x64xf32, #tpu.memory_space<vmem>>, vector<4x64xf32>
    %64 = arith.addf %63, %62 : vector<4x64xf32>
    %c0_34 = arith.constant 0 : index
    %c0_35 = arith.constant 0 : index
    %65 = vector.load %arg8[%c0_34, %c0_35] : memref<4x64xf32, #tpu.memory_space<vmem>>, vector<4x64xf32>
    tpu.vector_store %arg8[%c0_34, %c0_35], %64 {strides = array<i32>} : memref<4x64xf32, #tpu.memory_space<vmem>>, vector<4x64xf32>,
    %66 = vector.extract_strided_slice %52 {offsets = [8, 1], sizes = [4, 63], strides = [1, 1]} : vector<12x64xf32> to vector<4x63xf32>
    %67 = vector.extract_strided_slice %22 {offsets = [0, 0], sizes = [1, 63], strides = [1, 1]} : vector<1x64xi1> to vector<1x63xi1>
    %cst_36 = arith.constant 0.000000e+00 : f32
    %68 = vector.shape_cast %67 : vector<1x63xi1> to vector<1x63xi1>
    %69 = vector.broadcast %68 : vector<1x63xi1> to vector<4x63xi1>
    %70 = vector.broadcast %cst_36 : f32 to vector<4x63xf32>
    %71 = arith.select %69, %66, %70 : vector<4x63xi1>, vector<4x63xf32>
    %c0_37 = arith.constant 0 : index
    %c0_38 = arith.constant 0 : index
    %72 = vector.load %arg8[%c0_37, %c0_38] : memref<4x64xf32, #tpu.memory_space<vmem>>, vector<4x63xf32>
    %73 = arith.addf %72, %71 : vector<4x63xf32>
    %c0_39 = arith.constant 0 : index
    %c0_40 = arith.constant 0 : index
    %74 = vector.load %arg8[%c0_39, %c0_40] : memref<4x64xf32, #tpu.memory_space<vmem>>, vector<4x63xf32>
    tpu.vector_store %arg8[%c0_39, %c0_40], %73 {strides = array<i32>} : memref<4x64xf32, #tpu.memory_space<vmem>>, vector<4x63xf32>,
    %c2 = arith.constant 2 : index
    %c0_41 = arith.constant 0 : index
    %c0_42 = arith.constant 0 : index
    %75 = vector.load %arg5[%c2, %c0_41, %c0_42] : memref<3x12x16xf32, #tpu.memory_space<vmem>>, vector<1x12x16xf32>
    %76 = vector.shape_cast %75 : vector<1x12x16xf32> to vector<12x16xf32>
    %cst_43 = arith.constant dense<0.000000e+00> : vector<12x64xf32>
    %77 = tpu.matmul %76, %24, %cst_43 {dimension_numbers = #tpu.dot_dimension_numbers<[1], [0], [0], [1], [0, 0, 1, 1], [], []>} : vector<12x16xf32>, vector<16x64xf32>, vector<12x64xf32> -> vector<12x64xf32>
    %78 = vector.extract_strided_slice %77 {offsets = [0, 7], sizes = [4, 56], strides = [1, 1]} : vector<12x64xf32> to vector<4x56xf32>
    %79 = vector.extract_strided_slice %20 {offsets = [0, 0], sizes = [1, 56], strides = [1, 1]} : vector<1x64xi1> to vector<1x56xi1>
    %cst_44 = arith.constant 0.000000e+00 : f32
    %80 = vector.shape_cast %79 : vector<1x56xi1> to vector<1x56xi1>
    %81 = vector.broadcast %80 : vector<1x56xi1> to vector<4x56xi1>
    %82 = vector.broadcast %cst_44 : f32 to vector<4x56xf32>
    %83 = arith.select %81, %78, %82 : vector<4x56xi1>, vector<4x56xf32>
    %c0_45 = arith.constant 0 : index
    %c0_46 = arith.constant 0 : index
    %84 = vector.load %arg8[%c0_45, %c0_46] : memref<4x64xf32, #tpu.memory_space<vmem>>, vector<4x56xf32>
    %85 = arith.addf %84, %83 : vector<4x56xf32>
    %c0_47 = arith.constant 0 : index
    %c0_48 = arith.constant 0 : index
    %86 = vector.load %arg8[%c0_47, %c0_48] : memref<4x64xf32, #tpu.memory_space<vmem>>, vector<4x56xf32>
    tpu.vector_store %arg8[%c0_47, %c0_48], %85 {strides = array<i32>} : memref<4x64xf32, #tpu.memory_space<vmem>>, vector<4x56xf32>,
    %87 = vector.extract_strided_slice %77 {offsets = [4, 8], sizes = [4, 56], strides = [1, 1]} : vector<12x64xf32> to vector<4x56xf32>
    %c0_49 = arith.constant 0 : index
    %c0_50 = arith.constant 0 : index
    %88 = vector.load %arg8[%c0_49, %c0_50] : memref<4x64xf32, #tpu.memory_space<vmem>>, vector<4x56xf32>
    %89 = arith.addf %88, %87 : vector<4x56xf32>
    %c0_51 = arith.constant 0 : index
    %c0_52 = arith.constant 0 : index
    %90 = vector.load %arg8[%c0_51, %c0_52] : memref<4x64xf32, #tpu.memory_space<vmem>>, vector<4x56xf32>
    tpu.vector_store %arg8[%c0_51, %c0_52], %89 {strides = array<i32>} : memref<4x64xf32, #tpu.memory_space<vmem>>, vector<4x56xf32>,
    %91 = vector.extract_strided_slice %77 {offsets = [8, 9], sizes = [4, 55], strides = [1, 1]} : vector<12x64xf32> to vector<4x55xf32>
    %92 = vector.extract_strided_slice %22 {offsets = [0, 0], sizes = [1, 55], strides = [1, 1]} : vector<1x64xi1> to vector<1x55xi1>
    %cst_53 = arith.constant 0.000000e+00 : f32
    %93 = vector.shape_cast %92 : vector<1x55xi1> to vector<1x55xi1>
    %94 = vector.broadcast %93 : vector<1x55xi1> to vector<4x55xi1>
    %95 = vector.broadcast %cst_53 : f32 to vector<4x55xf32>
    %96 = arith.select %94, %91, %95 : vector<4x55xi1>, vector<4x55xf32>
    %c0_54 = arith.constant 0 : index
    %c0_55 = arith.constant 0 : index
    %97 = vector.load %arg8[%c0_54, %c0_55] : memref<4x64xf32, #tpu.memory_space<vmem>>, vector<4x55xf32>
    %98 = arith.addf %97, %96 : vector<4x55xf32>
    %c0_56 = arith.constant 0 : index
    %c0_57 = arith.constant 0 : index
    %99 = vector.load %arg8[%c0_56, %c0_57] : memref<4x64xf32, #tpu.memory_space<vmem>>, vector<4x55xf32>
    tpu.vector_store %arg8[%c0_56, %c0_57], %98 {strides = array<i32>} : memref<4x64xf32, #tpu.memory_space<vmem>>, vector<4x55xf32>,
    %c0_58 = arith.constant 0 : index
    %c0_59 = arith.constant 0 : index
    %c0_60 = arith.constant 0 : index
    %100 = vector.load %arg5[%c0_58, %c0_59, %c0_60] : memref<3x12x16xf32, #tpu.memory_space<vmem>>, vector<1x12x16xf32>
    %101 = vector.shape_cast %100 : vector<1x12x16xf32> to vector<12x16xf32>
    %c0_61 = arith.constant 0 : index
    %c0_62 = arith.constant 0 : index
    %c0_63 = arith.constant 0 : index
    %c0_64 = arith.constant 0 : index
    %102 = vector.load %arg3[%c0_61, %c0_62, %c0_63, %c0_64] : memref<1x1x16x8xf32, #tpu.memory_space<vmem>>, vector<1x1x16x8xf32>
    %103 = vector.shape_cast %102 : vector<1x1x16x8xf32> to vector<16x8xf32>
    %cst_65 = arith.constant dense<0.000000e+00> : vector<12x8xf32>
    %104 = tpu.matmul %101, %103, %cst_65 {dimension_numbers = #tpu.dot_dimension_numbers<[1], [0], [0], [1], [0, 0, 1, 1], [], []>} : vector<12x16xf32>, vector<16x8xf32>, vector<12x8xf32> -> vector<12x8xf32>
    %c2_66 = arith.constant 2 : index
    %c0_67 = arith.constant 0 : index
    %c0_68 = arith.constant 0 : index
    %105 = vector.load %arg5[%c2_66, %c0_67, %c0_68] : memref<3x12x16xf32, #tpu.memory_space<vmem>>, vector<1x12x16xf32>
    %106 = vector.shape_cast %105 : vector<1x12x16xf32> to vector<12x16xf32>
    %c0_69 = arith.constant 0 : index
    %c0_70 = arith.constant 0 : index
    %c0_71 = arith.constant 0 : index
    %c0_72 = arith.constant 0 : index
    %107 = vector.load %arg4[%c0_69, %c0_70, %c0_71, %c0_72] : memref<1x1x16x8xf32, #tpu.memory_space<vmem>>, vector<1x1x16x8xf32>
    %108 = vector.shape_cast %107 : vector<1x1x16x8xf32> to vector<16x8xf32>
    %cst_73 = arith.constant dense<0.000000e+00> : vector<12x8xf32>
    %109 = tpu.matmul %106, %108, %cst_73 {dimension_numbers = #tpu.dot_dimension_numbers<[1], [0], [0], [1], [0, 0, 1, 1], [], []>} : vector<12x16xf32>, vector<16x8xf32>, vector<12x8xf32> -> vector<12x8xf32>
    %c0_74 = arith.constant 0 : index
    %c1_75 = arith.constant 1 : index
    %110 = vector.load %arg8[%c0_74, %c1_75] : memref<4x64xf32, #tpu.memory_space<vmem>>, vector<4x7xf32>
    %111 = vector.extract_strided_slice %104 {offsets = [0, 0], sizes = [4, 7], strides = [1, 1]} : vector<12x8xf32> to vector<4x7xf32>
    %112 = arith.addf %110, %111 : vector<4x7xf32>
    %c0_76 = arith.constant 0 : index
    %c1_77 = arith.constant 1 : index
    %113 = vector.load %arg8[%c0_76, %c1_77] : memref<4x64xf32, #tpu.memory_space<vmem>>, vector<4x7xf32>
    tpu.vector_store %arg8[%c0_76, %c1_77], %112 {strides = array<i32>} : memref<4x64xf32, #tpu.memory_space<vmem>>, vector<4x7xf32>,
    %c0_78 = arith.constant 0 : index
    %c57 = arith.constant 57 : index
    %114 = vector.load %arg8[%c0_78, %c57] : memref<4x64xf32, #tpu.memory_space<vmem>>, vector<4x7xf32>
    %115 = vector.extract_strided_slice %109 {offsets = [0, 0], sizes = [4, 7], strides = [1, 1]} : vector<12x8xf32> to vector<4x7xf32>
    %116 = arith.addf %114, %115 : vector<4x7xf32>
    %c0_79 = arith.constant 0 : index
    %c57_80 = arith.constant 57 : index
    %117 = vector.load %arg8[%c0_79, %c57_80] : memref<4x64xf32, #tpu.memory_space<vmem>>, vector<4x7xf32>
    tpu.vector_store %arg8[%c0_79, %c57_80], %116 {strides = array<i32>} : memref<4x64xf32, #tpu.memory_space<vmem>>, vector<4x7xf32>,
    %c0_81 = arith.constant 0 : index
    %c0_82 = arith.constant 0 : index
    %118 = vector.load %arg8[%c0_81, %c0_82] : memref<4x64xf32, #tpu.memory_space<vmem>>, vector<4x8xf32>
    %119 = vector.extract_strided_slice %104 {offsets = [4, 0], sizes = [4, 8], strides = [1, 1]} : vector<12x8xf32> to vector<4x8xf32>
    %120 = arith.addf %118, %119 : vector<4x8xf32>
    %c0_83 = arith.constant 0 : index
    %c0_84 = arith.constant 0 : index
    %121 = vector.load %arg8[%c0_83, %c0_84] : memref<4x64xf32, #tpu.memory_space<vmem>>, vector<4x8xf32>
    tpu.vector_store %arg8[%c0_83, %c0_84], %120 {strides = array<i32>} : memref<4x64xf32, #tpu.memory_space<vmem>>, vector<4x8xf32>,
    %c0_85 = arith.constant 0 : index
    %c56 = arith.constant 56 : index
    %122 = vector.load %arg8[%c0_85, %c56] : memref<4x64xf32, #tpu.memory_space<vmem>>, vector<4x8xf32>
    %123 = vector.extract_strided_slice %109 {offsets = [4, 0], sizes = [4, 8], strides = [1, 1]} : vector<12x8xf32> to vector<4x8xf32>
    %124 = arith.addf %122, %123 : vector<4x8xf32>
    %c0_86 = arith.constant 0 : index
    %c56_87 = arith.constant 56 : index
    %125 = vector.load %arg8[%c0_86, %c56_87] : memref<4x64xf32, #tpu.memory_space<vmem>>, vector<4x8xf32>
    tpu.vector_store %arg8[%c0_86, %c56_87], %124 {strides = array<i32>} : memref<4x64xf32, #tpu.memory_space<vmem>>, vector<4x8xf32>,
    %c0_88 = arith.constant 0 : index
    %c0_89 = arith.constant 0 : index
    %126 = vector.load %arg8[%c0_88, %c0_89] : memref<4x64xf32, #tpu.memory_space<vmem>>, vector<4x7xf32>
    %127 = vector.extract_strided_slice %104 {offsets = [8, 1], sizes = [4, 7], strides = [1, 1]} : vector<12x8xf32> to vector<4x7xf32>
    %128 = arith.addf %126, %127 : vector<4x7xf32>
    %c0_90 = arith.constant 0 : index
    %c0_91 = arith.constant 0 : index
    %129 = vector.load %arg8[%c0_90, %c0_91] : memref<4x64xf32, #tpu.memory_space<vmem>>, vector<4x7xf32>
    tpu.vector_store %arg8[%c0_90, %c0_91], %128 {strides = array<i32>} : memref<4x64xf32, #tpu.memory_space<vmem>>, vector<4x7xf32>,
    %c0_92 = arith.constant 0 : index
    %c56_93 = arith.constant 56 : index
    %130 = vector.load %arg8[%c0_92, %c56_93] : memref<4x64xf32, #tpu.memory_space<vmem>>, vector<4x7xf32>
    %131 = vector.extract_strided_slice %109 {offsets = [8, 1], sizes = [4, 7], strides = [1, 1]} : vector<12x8xf32> to vector<4x7xf32>
    %132 = arith.addf %130, %131 : vector<4x7xf32>
    %c0_94 = arith.constant 0 : index
    %c56_95 = arith.constant 56 : index
    %133 = vector.load %arg8[%c0_94, %c56_95] : memref<4x64xf32, #tpu.memory_space<vmem>>, vector<4x7xf32>
    tpu.vector_store %arg8[%c0_94, %c56_95], %132 {strides = array<i32>} : memref<4x64xf32, #tpu.memory_space<vmem>>, vector<4x7xf32>,
    %c0_96 = arith.constant 0 : index
    %c0_97 = arith.constant 0 : index
    %134 = vector.load %arg8[%c0_96, %c0_97] : memref<4x64xf32, #tpu.memory_space<vmem>>, vector<4x64xf32>
    %c0_98 = arith.constant 0 : index
    %c0_99 = arith.constant 0 : index
    %135 = vector.load %arg6[%c0_98, %c0_99] : memref<4x1xf32, #tpu.memory_space<vmem>>, vector<4x1xf32>
    %136 = vector.broadcast %135 : vector<4x1xf32> to vector<4x64xf32>
    %137 = arith.addf %134, %136 : vector<4x64xf32>
    %c0_100 = arith.constant 0 : index
    %c0_101 = arith.constant 0 : index
    %c0_102 = arith.constant 0 : index
    %138 = vector.load %arg7[%c0_100, %c0_101, %c0_102] : memref<1x4x64xf32, #tpu.memory_space<vmem>>, vector<1x4x64xf32>
    %139 = vector.shape_cast %138 : vector<1x4x64xf32> to vector<4x64xf32>
    %140 = vector.shape_cast %137 : vector<4x64xf32> to vector<1x4x64xf32>
    tpu.vector_store %arg7[%c0_100, %c0_101, %c0_102], %140 {strides = array<i32>} : memref<1x4x64xf32, #tpu.memory_space<vmem>>, vector<1x4x64xf32>,
    return
  }
  func.func @transform_0(%arg0: i32, %arg1: i32) -> (i32, i32, i32) {
    %c0_i32 = arith.constant 0 : i32
    %c0_i32_0 = arith.constant 0 : i32
    return %arg0, %c0_i32, %arg1 : i32, i32, i32
  }
  func.func @transform_1(%arg0: i32, %arg1: i32) -> (i32, i32, i32, i32) {
    %c0_i32 = arith.constant 0 : i32
    %c0_i32_0 = arith.constant 0 : i32
    %c0_i32_1 = arith.constant 0 : i32
    return %arg0, %arg1, %c0_i32, %c0_i32_0 : i32, i32, i32, i32
  }
  func.func @transform_2(%arg0: i32, %arg1: i32) -> (i32, i32, i32, i32) {
    %c0_i32 = arith.constant 0 : i32
    %c0_i32_0 = arith.constant 0 : i32
    %c0_i32_1 = arith.constant 0 : i32
    return %arg0, %arg1, %c0_i32, %c0_i32_0 : i32, i32, i32, i32
  }
  func.func @transform_3(%arg0: i32, %arg1: i32) -> (i32, i32, i32) {
    %c0_i32 = arith.constant 0 : i32
    %c0_i32_0 = arith.constant 0 : i32
    %c0_i32_1 = arith.constant 0 : i32
    %c0_i32_2 = arith.constant 0 : i32
    return %c0_i32, %c0_i32_0, %c0_i32_1 : i32, i32, i32
  }
  func.func @transform_4(%arg0: i32, %arg1: i32) -> (i32, i32) {
    %c0_i32 = arith.constant 0 : i32
    %c0_i32_0 = arith.constant 0 : i32
    %c0_i32_1 = arith.constant 0 : i32
    return %c0_i32, %c0_i32_0 : i32, i32
  }
  func.func @transform_5(%arg0: i32, %arg1: i32) -> (i32, i32, i32) {
    %c0_i32 = arith.constant 0 : i32
    %c0_i32_0 = arith.constant 0 : i32
    return %arg0, %c0_i32, %arg1 : i32, i32, i32
  }
}

</mosaic_0001>

<bundles_post_ra>
// kernel: downsample_depth.1
= control target key start
LH: loop header
LB: loop body
LE: loop exit
PB: predicated region body
PF: predicated region fallthrough
CT: control target
= control target key end

     0   :  { %s1209_s18 = smov 0   ;;  %s1211_s19 = smov 0   ;;  %s1320_s0 = inlined_call_operand.vmem [shape: f32[2,16,64], index: 0, kind: input, shape index: {}]   ;;  %s1321_s1 = inlined_call_operand.vmem [shape: f32[2,1,16,8], index: 1, kind: input, shape index: {}, may-alias: {1,2}]   ;;  %s1322_s2 = inlined_call_operand.vmem [shape: f32[2,1,16,8], index: 2, kind: input, shape index: {}, may-alias: {1,2}]   ;;  %s1323_s3 = inlined_call_operand.vmem [shape: f32[3,12,16], index: 3, kind: input, shape index: {}]   ;;  %s1324_s4 = inlined_call_operand.vmem [shape: f32[4,1], index: 4, kind: input, shape index: {}]   ;;  %s1325_s5 = inlined_call_operand.vmem [shape: f32[2,4,64], index: 5, kind: output, shape index: {}]  }
   0x1   :  { %s1213_s20 = smov 0  }
   0x2 LB: > { %s27_s21 = sadd.s32 1, %s1160_s19  ;;  %p1019_p0 = scmp.ge.s32.totalorder %s1164_s20, 1  ;;  %s1164_s20 = sphi %s1213_s20, %s15_s20   ;;  %s1160_s19 = sphi %s1211_s19, %s1331_s19   ;;  %s1156_s18 = sphi %s1209_s18, %s1330_s18  }
   0x3   : > { %p29_p1 = scmp.ge.s32.totalorder %s27_s21, 2  ;;  %p238_p2 = scmp.lt.s32.totalorder %s1164_s20, 3 }
   0x5   : > { %s1333_s21 = smov (%p29_p1, %s27_s21), 0  ;;  %p239_p3 = pnand %p1019_p0, %p238_p2 }
   0x6   : > { %p289_p4 = scmp.lt.s32.totalorder (!%p239_p3), %s1156_s18, 1  ;;  %s1167_s27 = smov (!%p239_p3), 7  }
   0x7   : > { %242 = sbr.rel (%p239_p3) target bundleno = 484 (0x1e4), region = 40  ;;  %s1168_s28 = smov (!%p239_p3), 9  }
   0x8   : > { %s1170_s30 = smov (!%p239_p3), 8   ;;  %s1171_s6 = smov (!%p239_p3), 121  }
   0x9   : > { %s1173_s8 = smov (!%p239_p3), 119   ;;  %s1175_s9 = smov (!%p239_p3), 120  }
   0xa   : > { %s1176_s10 = smov (!%p239_p3), 57   ;;  %s1177_s13 = smov (!%p239_p3), 56  }
   0xb   : > { %s1178_s14 = smov (!%p239_p3), 55  }
   0xc   : > { %v342_v0 = vld [vmem:[%s1323_s3] sm:$0xff]  ;;  %vm344_vm0 = vcmask 130048   ;;  %v1029_v1 = vld [vmem:[%s1323_s3 + $0x10] sm:$0xff]  ;;  %s1335_s18 = smov (!%p289_p4, %s1156_s18), 1  ;;  %v343_v4 = vld [vmem:[%s1323_s3 + $0x8] sm:$0xf]  ;;  %v324_v30 = vlaneseq }
   0xd   : > { %1072 = vmatprep.mubr.msk.f32.mxu0 %vm344_vm0, %v342_v0  ;;  %1079 = vmatprep.mubr.msk.f32.mxu1 %vm344_vm0, %v1029_v1  ;;  %s1045_s26 = sshll.u32 %s1335_s18, 4  ;;  %v1030_v5 = vld [vmem:[%s1323_s3 + $0x18] sm:$0xf]  ;;  %v1033_v6 = vld [vmem:[%s1323_s3 + $0x20] sm:$0xff]  ;;  %v1034_v9 = vld [vmem:[%s1323_s3 + $0x28] sm:$0xf] }
   0xe   : > { %s296_s29 = scalar_lea.vmem %s1320_s0, %s1045_s26  ;;  %s305_s7 = scalar_lea.vmem %s1321_s1, %s1045_s26  ;;  %v1040_v12 = vld [vmem:[%s1323_s3 + $0x28] sm:$0xf]  ;;  %vm322_vm1 = vcmask 519168   ;;  %v1166_v14 = vmov 0.0   ;;  %v1174_v26 = vmov 0   ;;  %v325_v31 = vand.u32 127, %v324_v30 }
   0xf   : > { %v341_v2 = vld [vmem:[%s296_s29 + $0x8] sm:$0xff]  ;;  %v340_v3 = vld [vmem:[%s296_s29] sm:$0xff]  ;;  %s314_s16 = scalar_lea.vmem %s1322_s2, %s1045_s26  ;;  %323 = vst.msk [vmem:[#allocation2] sm:$0xf] %vm322_vm1, %v1166_v14  ;;  %s1169_s29 = smov 1   ;;  %1140 = vset.pattern.permute.xlu1 %v1174_v26  ;;  %1141 = vset.pattern.permute.xlu0 %v1174_v26  ;;  %vm435_vm3 = vcmask 519240  }
  0x10   : > { %1068 = vmatprep.subr.mxu0 %v341_v2  ;;  %1075 = vmatprep.subr.mxu1 %v341_v2  ;;  %v674_v7 = vld [vmem:[%s305_s7 + $0x8] sm:$0xff]  ;;  %v673_v8 = vld [vmem:[%s305_s7] sm:$0xff]  ;;  %s1172_s7 = smov 127   ;;  %v330_v32 = vand.u32 7, %v325_v31  ;;  %vm443_vm4 = vcmask 519232   ;;  %vm546_vm6 = vcmask 519176  }
  0x11   : > { %1069 = vmatpush3.msra.mxu0 %v341_v2  ;;  %1076 = vmatpush3.msra.mxu1 %v341_v2  ;;  %v759_v10 = vld [vmem:[%s314_s16 + $0x8] sm:$0xff]  ;;  %v758_v11 = vld [vmem:[%s314_s16] sm:$0xff]  ;;  %vm560_vm7 = vcmask 510976   ;;  %vm653_vm8 = vcmask 453632   ;;  %vm669_vm9 = vcmask 445440   ;;  %vm847_vm10 = vcmask 60424  }
  0x12   : > { %1070 = vmatprep.subr.mxu0 %v340_v3  ;;  %1077 = vmatprep.subr.mxu1 %v340_v3  ;;  %v672_v13 = vld [vmem:[%s1323_s3 + $0x8] sm:$0xf]  ;;  %v888_v29 = vld [vmem:[%s1324_s4] sm:$0xf]  ;;  %vm1283_vm2 = vcmp.ne.s32.totalorder %v330_v32, 0  ;;  %vm1289_vm5 = vcmp.ne.s32.totalorder %v330_v32, 7 }
  0x13   : > { %1071 = vmatpush3.msra.mxu0 %v340_v3  ;;  %1078 = vmatpush3.msra.mxu1 %v340_v3  ;;  %vm855_vm11 = vcmask 519624   ;;  %vm861_vm12 = vcmask 60416   ;;  %vm869_vm13 = vcmask 519616   ;;  %vm877_vm14 = vcmask 52224   ;;  %s1026_s15 = sshll.u32 %s1335_s18, 2 }
  0x14   : > { %1073 = vmatmul.mubr.msk.f32.vlgmr.msra.gmra.mxu0 %vm344_vm0, %v343_v4  ;;  %1080 = vmatmul.mubr.msk.f32.vlgmr.msra.gmra.mxu1 %vm344_vm0, %v1030_v5  ;;  %vm885_vm15 = vcmask 511424   ;;  %s321_s22 = scalar_lea.vmem %s1325_s5, %s1026_s15 }
  0x15   : > { %1082 = vmatprep.subr.mxu0 %v341_v2  ;;  %1086 = vmatprep.mubr.msk.f32.mxu0 %vm344_vm0, %v1033_v6 }
  0x16   : > { %1083 = vmatpush3.msra.mxu0 %v341_v2  ;;  %1089 = vmatprep.subr.mxu1 %v674_v7  ;;  %v433_v34 = vld [vmem:[#allocation2] sm:$0xf] }
  0x17   : > { %1084 = vmatprep.subr.mxu0 %v340_v3  ;;  %1090 = vmatpush3.msra.mxu1 %v674_v7 }
  0x18   : > { %1085 = vmatpush3.msra.mxu0 %v340_v3  ;;  %1091 = vmatprep.subr.mxu1 %v673_v8 }
  0x19   : > { %1087 = vmatmul.mubr.msk.f32.vlgmr.msra.gmra.mxu0 %vm344_vm0, %v1034_v9  ;;  %1096 = vmatprep.subr.mxu0 %v759_v10 }
  0x1a   : > { %1097 = vmatpush3.msra.mxu0 %v759_v10  ;;  %1100 = vmatprep.mubr.msk.f32.mxu0 %vm344_vm0, %v1033_v6 }
  0x1b   : > { %1098 = vmatprep.subr.mxu0 %v758_v11  ;;  %1092 = vmatpush3.msra.mxu1 %v673_v8 }
  0x1c   : > { %1099 = vmatpush3.msra.mxu0 %v758_v11  ;;  %1093 = vmatprep.mubr.msk.f32.mxu1 %vm344_vm0, %v342_v0 }
  0x1d   : > { %1101 = vmatmul.mubr.msk.f32.vlgmr.msra.gmra.mxu0 %vm344_vm0, %v1040_v12  ;;  %1094 = vmatmul.mubr.msk.f32.vlgmr.msra.gmra.mxu1 %vm344_vm0, %v672_v13 }
  0xd4   : > { %v1074_v15 = vpop.f32.mrf.mxu0  ;;  %v1081_v16 = vpop.f32.mrf.mxu1 }
  0xd5   : > { %448 = vrot.lane.b32.xlu1 %v1074_v15, %s1167_s27 }
  0xd6   : > { %v417_v17 = vpop.f32.mrf.mxu0  ;;  %v1274_v18 = vpop.f32.mrf.mxu1 }
  0xd7   : > { %429 = vrot.lane.b32.xlu0 %v417_v17, %s1168_s28  ;;  %v438_v19 = vrot.slane %v417_v17, 4  ;;  %v549_v50 = vrot.slane %v1274_v18, 4 }
  0xd9   : > { %540 = vrot.lane.b32.xlu1 %v1274_v18, %s1169_s29  ;;  %v1088_v20 = vpop.f32.mrf.mxu0 }
  0xdb   : > { %439 = vrot.lane.b32.xlu0 %v438_v19, %s1170_s30  ;;  %v637_v21 = vpop.f32.mrf.mxu0 }
  0xdc   : > { %v656_v23 = vrot.slane %v637_v21, 4 }
  0xdd   : > { %647 = vrot.lane.b32.xlu1 %v637_v21, %s1171_s6  ;;  %v1102_v22 = vpop.f32.mrf.mxu0  ;;  %v1095_v24 = vpop.f32.mrf.mxu1 }
  0xdf   : > { %554 = vrot.lane.b32.xlu0 %v1081_v16, %s1172_s7  ;;  %v832_v25 = vpop.f32.mrf.mxu0  ;;  %v1277_v27 = vpop.f32.mrf.mxu1 }
  0xe0   : > { %v864_v28 = vrot.slane %v832_v25, 4  ;;  %v858_v10 = vrot.slane %v1277_v27, 4 }
  0xe1   : > { %663 = vrot.lane.b32.xlu1 %v1088_v20, %s1173_s8 }
  0xe3   : > { %657 = vrot.lane.b32.xlu0 %v656_v23, %s1175_s9 }
  0xe5   : > { %851 = vrot.lane.b32.xlu1 %v832_v25, %s1176_s10 }
  0xe7   : > { %843 = vrot.lane.b32.xlu0 %v1277_v27, %s1169_s29 }
  0xe9   : > { %873 = vrot.lane.b32.xlu1 %v1095_v24, %s1172_s7 }
  0xeb   : > { %865 = vrot.lane.b32.xlu0 %v864_v28, %s1177_s13 }
  0xed   : > { %891 = vperm.xlu1 %1140, %v888_v29  }
  0xef   : > { %881 = vrot.lane.b32.xlu0 %v1102_v22, %s1178_s14 }
 0x147   : > { %v449_v42 = vpop.permute.xlu1 %448 }
 0x148   : > { %v451_v43 = vsel %vm1289_vm5, %v449_v42, 0.0 }
 0x149   : > { %v430_v35 = vpop.permute.xlu0 %429 }
 0x14a   : > { %v432_v36 = vsel %vm1283_vm2, %v430_v35, 0.0 }
 0x14b   : > { %v434_v37 = vadd.f32 %v433_v34, %v432_v36  ;;  %v541_v46 = vpop.permute.xlu1 %540 }
 0x14c   : > { %v543_v47 = vsel %vm1283_vm2, %v541_v46, 0.0 }
 0x14d   : > { %436 = vst.msk [vmem:[#allocation2] sm:$0xf] %vm435_vm3, %v434_v37  ;;  %v440_v39 = vpop.permute.xlu0 %439 }
 0x14f   : > { %v648_v57 = vpop.permute.xlu1 %647 }
 0x150   : > { %v650_v58 = vsel %vm1283_vm2, %v648_v57, 0.0 }
 0x151   : > { %v555_v53 = vpop.permute.xlu0 %554 }
 0x152   : > { %v557_v55 = vsel %vm1289_vm5, %v555_v53, 0.0 }
 0x153   : > { %v664_v0 = vpop.permute.xlu1 %663 }
 0x154   : > { %v437_v38 = vld [vmem:[#allocation2] sm:$0xf]  ;;  %v666_v1 = vsel %vm1289_vm5, %v664_v0, 0.0 }
 0x155   : > { %v442_v40 = vadd.f32 %v440_v39, %v437_v38  ;;  %v658_v62 = vpop.permute.xlu0 %657 }
 0x157   : > { %444 = vst.msk [vmem:[#allocation2] sm:$0xf] %vm443_vm4, %v442_v40  ;;  %v852_v7 = vpop.permute.xlu1 %851 }
 0x159   : > { %v844_v5 = vpop.permute.xlu0 %843 }
 0x15b   : > { %v874_v16 = vpop.permute.xlu1 %873 }
 0x15d   : > { %v866_v14 = vpop.permute.xlu0 %865 }
 0x15e   : > { %v452_v44 = vld [vmem:[#allocation2] sm:$0xf] }
 0x15f   : > { %v453_v45 = vadd.f32 %v452_v44, %v451_v43 }
 0x161   : > { %454 = vst.msk [vmem:[#allocation2] sm:$0xf] %vm443_vm4, %v453_v45  ;;  %v882_v20 = vpop.permute.xlu0 %881 }
 0x168   : > { %v544_v48 = vld [vmem:[#allocation2] sm:$0xf]  ;;  %v892_v22 = vpop.permute.xlu1 %891 }
 0x169   : > { %v545_v49 = vadd.f32 %v544_v48, %v543_v47 }
 0x16b   : > { %547 = vst.msk [vmem:[#allocation2] sm:$0xf] %vm546_vm6, %v545_v49 }
 0x172   : > { %v548_v51 = vld [vmem:[#allocation2] sm:$0xf] }
 0x173   : > { %v551_v52 = vadd.f32 %v549_v50, %v548_v51 }
 0x175   : > { %552 = vst.msk [vmem:[#allocation2] sm:$0xf] %vm322_vm1, %v551_v52 }
 0x17c   : > { %v558_v54 = vld [vmem:[#allocation2] sm:$0xf] }
 0x17d   : > { %v559_v56 = vadd.f32 %v558_v54, %v557_v55 }
 0x17f   : > { %561 = vst.msk [vmem:[#allocation2] sm:$0xf] %vm560_vm7, %v559_v56 }
 0x186   : > { %v651_v59 = vld [vmem:[#allocation2] sm:$0xf] }
 0x187   : > { %v652_v60 = vadd.f32 %v651_v59, %v650_v58 }
 0x189   : > { %654 = vst.msk [vmem:[#allocation2] sm:$0xf] %vm653_vm8, %v652_v60 }
 0x190   : > { %v655_v61 = vld [vmem:[#allocation2] sm:$0xf] }
 0x191   : > { %v660_v63 = vadd.f32 %v658_v62, %v655_v61 }
 0x193   : > { %661 = vst.msk [vmem:[#allocation2] sm:$0xf] %vm653_vm8, %v660_v63 }
 0x19a   : > { %v667_v2 = vld [vmem:[#allocation2] sm:$0xf] }
 0x19b   : > { %v668_v3 = vadd.f32 %v667_v2, %v666_v1 }
 0x19d   : > { %670 = vst.msk [vmem:[#allocation2] sm:$0xf] %vm669_vm9, %v668_v3 }
 0x1a4   : > { %v841_v4 = vld [vmem:[#allocation2] sm:$0xf] }
 0x1a5   : > { %v846_v6 = vadd.f32 %v844_v5, %v841_v4 }
 0x1a7   : > { %848 = vst.msk [vmem:[#allocation2] sm:$0xf] %vm847_vm10, %v846_v6 }
 0x1ae   : > { %v849_v8 = vld [vmem:[#allocation2] sm:$0xf] }
 0x1af   : > { %v854_v9 = vadd.f32 %v852_v7, %v849_v8 }
 0x1b1   : > { %856 = vst.msk [vmem:[#allocation2] sm:$0xf] %vm855_vm11, %v854_v9 }
 0x1b8   : > { %v857_v11 = vld [vmem:[#allocation2] sm:$0xf] }
 0x1b9   : > { %v860_v12 = vadd.f32 %v858_v10, %v857_v11 }
 0x1bb   : > { %862 = vst.msk [vmem:[#allocation2] sm:$0xf] %vm861_vm12, %v860_v12 }
 0x1c2   : > { %v863_v13 = vld [vmem:[#allocation2] sm:$0xf] }
 0x1c3   : > { %v868_v15 = vadd.f32 %v866_v14, %v863_v13 }
 0x1c5   : > { %870 = vst.msk [vmem:[#allocation2] sm:$0xf] %vm869_vm13, %v868_v15 }
 0x1cc   : > { %v871_v17 = vld [vmem:[#allocation2] sm:$0xf] }
 0x1cd   : > { %v876_v18 = vadd.f32 %v874_v16, %v871_v17 }
 0x1cf   : > { %878 = vst.msk [vmem:[#allocation2] sm:$0xf] %vm877_vm14, %v876_v18 }
 0x1d6   : > { %v879_v19 = vld [vmem:[#allocation2] sm:$0xf] }
 0x1d7   : > { %v884_v21 = vadd.f32 %v882_v20, %v879_v19 }
 0x1d9   : > { %886 = vst.msk [vmem:[#allocation2] sm:$0xf] %vm885_vm15, %v884_v21 }
 0x1e0   : > { %v887_v23 = vld [vmem:[#allocation2] sm:$0xf] }
 0x1e1   : > { %v894_v24 = vadd.f32 %v892_v22, %v887_v23 }
 0x1e3   : > { %895 = vst.msk [vmem:[%s321_s22] sm:$0xf] %vm322_vm1, %v894_v24 }
 0x1e4 PF: > { %s15_s20 = sadd.s32 1, %s1164_s20   ;;  %s1330_s18 = smov %s1160_s19 }
 0x1e5   : > { %p12_p5 = scmp.ge.s32.totalorder %s15_s20, 4   ;;  %s1331_s19 = smov %s1333_s21 }
 0x1e7   :  { %14 = sbr.rel (!%p12_p5) target bundleno = 2 (0x2), region = 78 }

</bundles_post_ra>
